<compile_context>
chip_gen: v6e
topology: v6e:2x2x1
jax: 0.10.0
libtpu: 0.0.40
codegen_flags: <defaults>
</compile_context>

<pallas_src>
import functools

import jax
import jax.numpy as jnp
from jax.experimental import pallas as pl
from jax.experimental.pallas import tpu as pltpu

LOG_STD_MAX = 2.0
LOG_STD_MIN = -20.0


def _round_up(x, m):
    return ((x + m - 1) // m) * m


def _bf16_elementwise_ok():
    """v6e/v7x have bf16 VALUs; v5e does not (bf16 elementwise is emulated)."""
    try:
        kind = jax.devices()[0].device_kind.lower()
    except Exception:
        return True
    return not ("v5 lite" in kind or "v5e" in kind or "v5lite" in kind)


def actor_kernel(x_ref, w1_ref, w2_ref, wh_ref, b_ref, out_ref,
                 *, hidden1, hidden2, act, bf16_relu):
    # x_ref: [TB, Fp] bf16; weights bf16; packed bias row f32.
    x = x_ref[...]

    b1 = b_ref[:, :hidden1]                              # [1, H1]  f32
    b2 = b_ref[:, hidden1:hidden1 + hidden2]             # [1, H2]  f32
    bh = b_ref[:, hidden1 + hidden2:]                    # [1, HOp] f32 (padded)

    # fc1 + ReLU (MXU bf16, f32 accumulate)
    h1 = jnp.dot(x, w1_ref[...], preferred_element_type=jnp.float32) + b1
    if bf16_relu:
        h1 = jnp.maximum(h1.astype(jnp.bfloat16), 0.0)        # bf16 VPU
    else:
        h1 = jnp.maximum(h1, 0.0).astype(jnp.bfloat16)         # f32 VPU (v5e)

    # fc2 + ReLU
    h2 = jnp.dot(h1, w2_ref[...], preferred_element_type=jnp.float32) + b2
    if bf16_relu:
        h2 = jnp.maximum(h2.astype(jnp.bfloat16), 0.0)
    else:
        h2 = jnp.maximum(h2, 0.0).astype(jnp.bfloat16)

    # fused heads, lane-padded: cols [0:A]=mean, [A:2A]=log_std, [2A:128]=0
    head = jnp.dot(h2, wh_ref[...], preferred_element_type=jnp.float32) + bh

    # clamp only the log_std half (columns >= act); padded cols stay 0.
    col = jax.lax.broadcasted_iota(jnp.int32, head.shape, 1)
    clamped = jnp.clip(head, LOG_STD_MIN, LOG_STD_MAX)
    out_ref[...] = jnp.where(col >= act, clamped, head)


def prepare_actor_params(params):
    """One-time weight repacking (do NOT call per forward step).

    params: (w1 [F,H1], b1 [1,H1], w2 [H1,H2], b2 [1,H2],
             wm [H2,A], bm [1,A], ws [H2,A], bs [1,A])   all f32, [in, out].
    """
    w1, b1, w2, b2, wm, bm, ws, bs = params
    F, H1 = w1.shape
    H2 = w2.shape[1]
    A = wm.shape[1]

    Fp = _round_up(F, 128)          # lane-aligned feature dim
    HOp = _round_up(2 * A, 128)     # lane-dense head output width

    # w1: zero-pad feature rows (numerically identical), bf16 for MXU
    w1p = jnp.zeros((Fp, H1), jnp.bfloat16).at[:F, :].set(w1.astype(jnp.bfloat16))
    w2b = w2.astype(jnp.bfloat16)

    # fused, lane-padded head weight: [H2, HOp] = [wm | ws | 0]
    whb = jnp.zeros((H2, HOp), jnp.bfloat16)
    whb = whb.at[:, :A].set(wm.astype(jnp.bfloat16))
    whb = whb.at[:, A:2 * A].set(ws.astype(jnp.bfloat16))

    # single packed bias row: [b1 | b2 | bm | bs | 0], padded to 128 lanes
    bias_w = _round_up(H1 + H2 + HOp, 128)
    b_packed = jnp.zeros((1, bias_w), jnp.float32)
    b_packed = b_packed.at[:, :H1].set(b1)
    b_packed = b_packed.at[:, H1:H1 + H2].set(b2)
    b_packed = b_packed.at[:, H1 + H2:H1 + H2 + A].set(bm)
    b_packed = b_packed.at[:, H1 + H2 + A:H1 + H2 + 2 * A].set(bs)

    meta = dict(F=F, Fp=Fp, H1=H1, H2=H2, A=A, HOp=HOp, bias_w=bias_w)
    return (w1p, w2b, whb, b_packed), meta


def actor_forward(state, prepared, meta, *, block_b=1024):
    """state: [B, state_size] f32. Returns (mean [B, A], log_std [B, A])."""
    w1p, w2b, whb, b_packed = prepared
    F, Fp = meta["F"], meta["Fp"]
    H1, H2, A = meta["H1"], meta["H2"], meta["A"]
    HOp, bias_w = meta["HOp"], meta["bias_w"]

    B = state.shape[0]

    # batch tiling: multiples of 16 (bf16 vreg = [16,128]); weights resident
    block_b = _round_up(block_b, 16)
    tb = min(block_b, _round_up(B, 16))
    Bp = _round_up(B, tb)

    # per-call prep: only pad + cast the state tile
    xp = jnp.zeros((Bp, Fp), jnp.bfloat16).at[:B, :F].set(state.astype(jnp.bfloat16))

    kernel = functools.partial(actor_kernel, hidden1=H1, hidden2=H2, act=A,
                               bf16_relu=_bf16_elementwise_ok())

    flops = 2 * Bp * (Fp * H1 + H1 * H2 + H2 * HOp)
    bytes_accessed = (xp.size * 2 + w1p.size * 2 + w2b.size * 2 + whb.size * 2
                      + b_packed.size * 4 + Bp * HOp * 4)

    out = pl.pallas_call(
        kernel,
        out_shape=jax.ShapeDtypeStruct((Bp, HOp), jnp.float32),
        grid=(Bp // tb,),
        in_specs=[
            pl.BlockSpec((tb, Fp), lambda i: (i, 0)),       # state tile
            pl.BlockSpec((Fp, H1), lambda i: (0, 0)),       # w1 (resident)
            pl.BlockSpec((H1, H2), lambda i: (0, 0)),       # w2 (resident)
            pl.BlockSpec((H2, HOp), lambda i: (0, 0)),      # fused head weight
            pl.BlockSpec((1, bias_w), lambda i: (0, 0)),    # packed biases
        ],
        out_specs=pl.BlockSpec((tb, HOp), lambda i: (i, 0)),
        compiler_params=pltpu.CompilerParams(
            dimension_semantics=("parallel",)),
        cost_estimate=pl.CostEstimate(
            flops=flops, transcendentals=0, bytes_accessed=bytes_accessed),
    )(xp, w1p, w2b, whb, b_packed)

    mean = out[:B, :A]
    log_std = out[:B, A:2 * A]     # already clamped in-kernel
    return mean, log_std


def xavier_uniform(key, fan_in, fan_out):
    # Matches torch.nn.init.xavier_uniform_ (gain=1); stored as [in, out].
    bound = (6.0 / (fan_in + fan_out)) ** 0.5
    return jax.random.uniform(key, (fan_in, fan_out), jnp.float32, -bound, bound)


def init_actor_params(key, state_size=33, action_size=4, hidden1=256, hidden2=256):
    k1, k2, k3, k4 = jax.random.split(key, 4)
    w1 = xavier_uniform(k1, state_size, hidden1)
    b1 = jnp.zeros((1, hidden1), jnp.float32)
    w2 = xavier_uniform(k2, hidden1, hidden2)
    b2 = jnp.zeros((1, hidden2), jnp.float32)
    wm = xavier_uniform(k3, hidden2, action_size)
    bm = jnp.zeros((1, action_size), jnp.float32)
    ws = xavier_uniform(k4, hidden2, action_size)
    bs = jnp.zeros((1, action_size), jnp.float32)
    return (w1, b1, w2, b2, wm, bm, ws, bs)


if __name__ == "__main__":
    key = jax.random.PRNGKey(0)
    pkey, xkey = jax.random.split(key)

    state_size, action_size, hidden1, hidden2 = 33, 4, 256, 256
    batch = 8

    params = init_actor_params(pkey, state_size, action_size, hidden1, hidden2)
    state = jax.random.normal(xkey, (batch, state_size), jnp.float32)

    # one-time weight repacking (hoisted out of the per-call path)
    prepared, meta = prepare_actor_params(params)
    jax.block_until_ready(prepared)

    mean, log_std = actor_forward(state, prepared, meta)
    jax.block_until_ready((mean, log_std))

    w1, b1, w2, b2, wm, bm, ws, bs = params

    # Reference 1: same bf16-weight path in pure JAX (tight tolerance).
    w1b, w2b = w1.astype(jnp.bfloat16), w2.astype(jnp.bfloat16)
    wmb, wsb = wm.astype(jnp.bfloat16), ws.astype(jnp.bfloat16)
    xb = state.astype(jnp.bfloat16)
    h1 = jnp.maximum(jnp.dot(xb, w1b, preferred_element_type=jnp.float32) + b1, 0.0)
    h2 = jnp.maximum(jnp.dot(h1.astype(jnp.bfloat16), w2b,
                             preferred_element_type=jnp.float32) + b2, 0.0)
    h2b = h2.astype(jnp.bfloat16)
    mean_ref = jnp.dot(h2b, wmb, preferred_element_type=jnp.float32) + bm
    logstd_ref = jnp.clip(jnp.dot(h2b, wsb, preferred_element_type=jnp.float32) + bs,
                          LOG_STD_MIN, LOG_STD_MAX)

    # Reference 2: full-f32 PyTorch-equivalent path (loose tolerance, bf16 MXU).
    h1f = jnp.maximum(state @ w1 + b1, 0.0)
    h2f = jnp.maximum(h1f @ w2 + b2, 0.0)
    mean_f32 = h2f @ wm + bm
    logstd_f32 = jnp.clip(h2f @ ws + bs, LOG_STD_MIN, LOG_STD_MAX)

    assert mean.shape == (batch, action_size)
    assert log_std.shape == (batch, action_size)
    assert jnp.allclose(mean, mean_ref, atol=3e-3, rtol=3e-3)
    assert jnp.allclose(log_std, logstd_ref, atol=3e-3, rtol=3e-3)
    assert jnp.allclose(mean, mean_f32, atol=1e-1, rtol=5e-2)
    assert jnp.allclose(log_std, logstd_f32, atol=1e-1, rtol=5e-2)

    print("KERNEL_OK")
</pallas_src>

<mosaic_0001>
module attributes {stable_mosaic.version = 11 : i64} {
  func.func @actor_kernel(%arg0: i32, %arg1: memref<16x128xbf16, #tpu.memory_space<vmem>>, %arg2: memref<128x256xbf16, #tpu.memory_space<vmem>>, %arg3: memref<256x256xbf16, #tpu.memory_space<vmem>>, %arg4: memref<256x128xbf16, #tpu.memory_space<vmem>>, %arg5: memref<1x640xf32, #tpu.memory_space<vmem>>, %arg6: memref<16x128xf32, #tpu.memory_space<vmem>>) attributes {dimension_semantics = [#tpu.dimension_semantics<parallel>], iteration_bounds = array<i64: 1>, scalar_prefetch = 0 : i64, scratch_operands = 0 : i64, tpu.core_type = #tpu.core_type<tc>, window_params = [{transform_indices = @transform_0, window_bounds = array<i64: 16, 128>}, {pipeline_mode = #tpu.pipeline_mode<synchronous>, transform_indices = @transform_1, window_bounds = array<i64: 128, 256>}, {pipeline_mode = #tpu.pipeline_mode<synchronous>, transform_indices = @transform_2, window_bounds = array<i64: 256, 256>}, {pipeline_mode = #tpu.pipeline_mode<synchronous>, transform_indices = @transform_3, window_bounds = array<i64: 256, 128>}, {pipeline_mode = #tpu.pipeline_mode<synchronous>, transform_indices = @transform_4, window_bounds = array<i64: 1, 640>}, {transform_indices = @transform_5, window_bounds = array<i64: 16, 128>}]} {
    %c0 = arith.constant 0 : index
    %c0_0 = arith.constant 0 : index
    %0 = vector.load %arg1[%c0, %c0_0] : memref<16x128xbf16, #tpu.memory_space<vmem>>, vector<16x128xbf16>
    %c0_1 = arith.constant 0 : index
    %c0_2 = arith.constant 0 : index
    %1 = vector.load %arg5[%c0_1, %c0_2] : memref<1x640xf32, #tpu.memory_space<vmem>>, vector<1x256xf32>
    %c0_3 = arith.constant 0 : index
    %c256 = arith.constant 256 : index
    %2 = vector.load %arg5[%c0_3, %c256] : memref<1x640xf32, #tpu.memory_space<vmem>>, vector<1x256xf32>
    %c0_4 = arith.constant 0 : index
    %c512 = arith.constant 512 : index
    %3 = vector.load %arg5[%c0_4, %c512] : memref<1x640xf32, #tpu.memory_space<vmem>>, vector<1x128xf32>
    %c0_5 = arith.constant 0 : index
    %c0_6 = arith.constant 0 : index
    %4 = vector.load %arg2[%c0_5, %c0_6] : memref<128x256xbf16, #tpu.memory_space<vmem>>, vector<128x256xbf16>
    %cst = arith.constant dense<0.000000e+00> : vector<16x256xf32>
    %5 = tpu.matmul %0, %4, %cst {dimension_numbers = #tpu.dot_dimension_numbers<[1], [0], [0], [1], [0, 0, 1, 1], [], []>} : vector<16x128xbf16>, vector<128x256xbf16>, vector<16x256xf32> -> vector<16x256xf32>
    %6 = vector.broadcast %1 : vector<1x256xf32> to vector<16x256xf32>
    %7 = arith.addf %5, %6 : vector<16x256xf32>
    %8 = arith.truncf %7 : vector<16x256xf32> to vector<16x256xbf16>
    %cst_7 = arith.constant 0.000000e+00 : bf16
    %9 = vector.broadcast %cst_7 : bf16 to vector<16x256xbf16>
    %10 = arith.maximumf %8, %9 : vector<16x256xbf16>
    %c0_8 = arith.constant 0 : index
    %c0_9 = arith.constant 0 : index
    %11 = vector.load %arg3[%c0_8, %c0_9] : memref<256x256xbf16, #tpu.memory_space<vmem>>, vector<256x256xbf16>
    %cst_10 = arith.constant dense<0.000000e+00> : vector<16x256xf32>
    %12 = tpu.matmul %10, %11, %cst_10 {dimension_numbers = #tpu.dot_dimension_numbers<[1], [0], [0], [1], [0, 0, 1, 1], [], []>} : vector<16x256xbf16>, vector<256x256xbf16>, vector<16x256xf32> -> vector<16x256xf32>
    %13 = vector.broadcast %2 : vector<1x256xf32> to vector<16x256xf32>
    %14 = arith.addf %12, %13 : vector<16x256xf32>
    %15 = arith.truncf %14 : vector<16x256xf32> to vector<16x256xbf16>
    %cst_11 = arith.constant 0.000000e+00 : bf16
    %16 = vector.broadcast %cst_11 : bf16 to vector<16x256xbf16>
    %17 = arith.maximumf %15, %16 : vector<16x256xbf16>
    %c0_12 = arith.constant 0 : index
    %c0_13 = arith.constant 0 : index
    %18 = vector.load %arg4[%c0_12, %c0_13] : memref<256x128xbf16, #tpu.memory_space<vmem>>, vector<256x128xbf16>
    %cst_14 = arith.constant dense<0.000000e+00> : vector<16x128xf32>
    %19 = tpu.matmul %17, %18, %cst_14 {dimension_numbers = #tpu.dot_dimension_numbers<[1], [0], [0], [1], [0, 0, 1, 1], [], []>} : vector<16x256xbf16>, vector<256x128xbf16>, vector<16x128xf32> -> vector<16x128xf32>
    %20 = vector.broadcast %3 : vector<1x128xf32> to vector<16x128xf32>
    %21 = arith.addf %19, %20 : vector<16x128xf32>
    %22 = tpu.iota {dimensions = array<i32: 1>} : vector<16x128xi32>
    %cst_15 = arith.constant -2.000000e+01 : f32
    %cst_16 = arith.constant 2.000000e+00 : f32
    %23 = vector.broadcast %cst_15 : f32 to vector<16x128xf32>
    %24 = arith.maximumf %23, %21 : vector<16x128xf32>
    %25 = vector.broadcast %cst_16 : f32 to vector<16x128xf32>
    %26 = arith.minimumf %25, %24 : vector<16x128xf32>
    %c4_i32 = arith.constant 4 : i32
    %27 = vector.broadcast %c4_i32 : i32 to vector<16x128xi32>
    %28 = arith.cmpi sge, %22, %27 : vector<16x128xi32>
    %29 = arith.select %28, %26, %21 : vector<16x128xi1>, vector<16x128xf32>
    %c0_17 = arith.constant 0 : index
    %c0_18 = arith.constant 0 : index
    %30 = vector.load %arg6[%c0_17, %c0_18] : memref<16x128xf32, #tpu.memory_space<vmem>>, vector<16x128xf32>
    tpu.vector_store %arg6[%c0_17, %c0_18], %29 {strides = array<i32>} : memref<16x128xf32, #tpu.memory_space<vmem>>, vector<16x128xf32>,
    return
  }
  func.func @transform_0(%arg0: i32) -> (i32, i32) {
    %c0_i32 = arith.constant 0 : i32
    %c0_i32_0 = arith.constant 0 : i32
    return %arg0, %c0_i32 : i32, i32
  }
  func.func @transform_1(%arg0: i32) -> (i32, i32) {
    %c0_i32 = arith.constant 0 : i32
    %c0_i32_0 = arith.constant 0 : i32
    %c0_i32_1 = arith.constant 0 : i32
    return %c0_i32, %c0_i32_0 : i32, i32
  }
  func.func @transform_2(%arg0: i32) -> (i32, i32) {
    %c0_i32 = arith.constant 0 : i32
    %c0_i32_0 = arith.constant 0 : i32
    %c0_i32_1 = arith.constant 0 : i32
    return %c0_i32, %c0_i32_0 : i32, i32
  }
  func.func @transform_3(%arg0: i32) -> (i32, i32) {
    %c0_i32 = arith.constant 0 : i32
    %c0_i32_0 = arith.constant 0 : i32
    %c0_i32_1 = arith.constant 0 : i32
    return %c0_i32, %c0_i32_0 : i32, i32
  }
  func.func @transform_4(%arg0: i32) -> (i32, i32) {
    %c0_i32 = arith.constant 0 : i32
    %c0_i32_0 = arith.constant 0 : i32
    %c0_i32_1 = arith.constant 0 : i32
    return %c0_i32, %c0_i32_0 : i32, i32
  }
  func.func @transform_5(%arg0: i32) -> (i32, i32) {
    %c0_i32 = arith.constant 0 : i32
    %c0_i32_0 = arith.constant 0 : i32
    return %arg0, %c0_i32 : i32, i32
  }
}

</mosaic_0001>

<bundles_post_ra>
// kernel: tpu_custom_call.1
= control target key start
LH: loop header
LB: loop body
LE: loop exit
PB: predicated region body
PF: predicated region fallthrough
CT: control target
= control target key end

     0   :  { %10 = vsyncpa [#allocation3], 0  ;;  %s1070_s0 = inlined_call_operand.hbm [shape: bf16[16,128], index: 0, kind: input, shape index: {}]   ;;  %s1071_s1 = inlined_call_operand.hbm [shape: bf16[128,256], index: 1, kind: input, shape index: {}]   ;;  %s1072_s2 = inlined_call_operand.hbm [shape: bf16[256,256], index: 2, kind: input, shape index: {}]   ;;  %s1073_s3 = inlined_call_operand.hbm [shape: bf16[256,128], index: 3, kind: input, shape index: {}]   ;;  %s1074_s4 = inlined_call_operand.vmem [shape: f32[1,640], index: 4, kind: input, shape index: {}]   ;;  %s1075_s5 = inlined_call_operand.hbm [shape: f32[16,128], index: 5, kind: output, shape index: {}]  }
   0x1   :  { %11 = vsyncpa [#allocation6], 0 }
   0x2   :  { %12 = vsyncpa [#allocation9], 0 }
   0x3   :  { %13 = vsyncpa [#allocation4], 0  ;;  %s992_s18 = smov [#allocation5]  }
   0x4   :  { %s31_s19 = sshll.u32 %s992_s18, 4  ;;  %s32_s19 = int_to_ptr.vmem [resolvable:$true] %s31_s19 }
   0x5   :  { %s892_s20 = scalar_lea.vmem %s32_s19, 2048  ;;  %p897_p1 = scmp.lt.s32.totalorder %s32_s19, %s32_s19 }
   0x6   :  { %p893_p0 = scmp.ne.s32.totalorder %s32_s19, %s892_s20  ;;  %p898_p2 = scmp.lt.s32.totalorder %s892_s20, %s892_s20 }
   0x8   :  { %p899_p3 = por %p898_p2, %p897_p1 }
   0xa   :  { %p900_p4 = pnand %p899_p3, %p893_p0 }
   0xc   :  { %903 = shalt.err (!%p900_p4)
}
   0xd   :  { %s993_s21 = smov 128   ;;  %s994_s22 = smov 8  }
   0xe   :  { %37 = dma.hbm_to_vmem [thread:$0]  %s1071_s1, 2048, %s32_s19, [#allocation6], %s993_s21, %s993_s21, %s994_s22  }
   0xf   :  { %s995_s25 = smov [#allocation2]  }
  0x10   :  { %s19_s26 = sshll.u32 %s995_s25, 4  ;;  %s20_s26 = int_to_ptr.vmem [resolvable:$true] %s19_s26 }
  0x11   :  { %s912_s27 = scalar_lea.vmem %s20_s26, 128  ;;  %p917_p6 = scmp.lt.s32.totalorder %s20_s26, %s20_s26 }
  0x12   :  { %p913_p5 = scmp.ne.s32.totalorder %s20_s26, %s912_s27  ;;  %p918_p7 = scmp.lt.s32.totalorder %s912_s27, %s912_s27 }
  0x14   :  { %p919_p8 = por %p918_p7, %p917_p6 }
  0x16   :  { %p920_p9 = pnand %p919_p8, %p913_p5 }
  0x18   :  { %923 = shalt.err (!%p920_p9)
}
  0x19   :  { %s996_s28 = smov 64   ;;  %s997_s29 = smov 4  }
  0x1a   :  { %25 = dma.hbm_to_vmem [thread:$0]  %s1070_s0, 128, %s20_s26, [#allocation3], %s996_s28, %s996_s28, %s997_s29  }
  0x1b   :  { %s998_s7 = smov [#allocation7]   ;;  %s999_s9 = smov [#allocation8]  }
  0x1c   :  { %s43_s8 = sshll.u32 %s998_s7, 4  ;;  %s55_s1 = sshll.u32 %s999_s9, 4  ;;  %s44_s8 = int_to_ptr.vmem [resolvable:$true] %s43_s8  ;;  %s56_s1 = int_to_ptr.vmem [resolvable:$true] %s55_s1 }
  0x1d   :  { %s932_s10 = scalar_lea.vmem %s44_s8, 4096  ;;  %p937_p11 = scmp.lt.s32.totalorder %s44_s8, %s44_s8 }
  0x1e   :  { %p933_p10 = scmp.ne.s32.totalorder %s44_s8, %s932_s10  ;;  %p938_p12 = scmp.lt.s32.totalorder %s932_s10, %s932_s10 }
  0x20   :  { %p939_p13 = por %p938_p12, %p937_p11 }
  0x22   :  { %p940_p0 = pnand %p939_p13, %p933_p10 }
  0x24   :  { %943 = shalt.err (!%p940_p0)
}
  0x25   :  { %49 = dma.hbm_to_vmem [thread:$0]  %s1072_s2, 4096, %s44_s8, [#allocation6], %s993_s21, %s993_s21, %s994_s22  }
  0x26   :  { %s952_s0 = scalar_lea.vmem %s56_s1, 2048  ;;  %p957_p2 = scmp.lt.s32.totalorder %s56_s1, %s56_s1 }
  0x27   :  { %p953_p1 = scmp.ne.s32.totalorder %s56_s1, %s952_s0  ;;  %p958_p3 = scmp.lt.s32.totalorder %s952_s0, %s952_s0 }
  0x29   :  { %p959_p4 = por %p958_p3, %p957_p2 }
  0x2b   :  { %p960_p5 = pnand %p959_p4, %p953_p1 }
  0x2d   :  { %963 = shalt.err (!%p960_p5)
}
  0x2e   :  { %61 = dma.hbm_to_vmem [thread:$0]  %s1073_s3, 2048, %s56_s1, [#allocation9], %s996_s28, %s996_s28, %s997_s29  }
  0x2f   :  { %984 = dma.done.wait [#allocation3], 128  }
  0x30   :  { %985 = vsyncadd [#allocation3], 4294967168 }
  0x31   :  { %986 = dma.done.wait [#allocation6], 6144  }
  0x32   :  { %987 = vsyncadd [#allocation6], 4294961152 }
  0x33   :  { %988 = dma.done.wait [#allocation9], 2048  }
  0x34   :  { %989 = vsyncadd [#allocation9], 4294965248  ;;  %v1000_v0 = vmov 0   ;;  %v795_v1 = vld [vmem:[#allocation5 + $0x74] ss:$8 sps:$4 sm:$0xff]   ;;  %v872_v54 = vld [vmem:[#allocation8 + $0x68] sm:$0xff]   ;;  %v99_v60 = vlaneseq }
  0x35   :  { %227 = vmatprep.mubr.bf16.mxu0 %v1000_v0  ;;  %v797_v2 = vld [vmem:[#allocation5 + $0x70] ss:$8 sps:$4 sm:$0xff]   ;;  %195 = vmatprep.subr.bf16.mxu0 %v795_v1  ;;  %v798_v3 = vld [vmem:[#allocation5 + $0x64] ss:$8 sps:$4 sm:$0xff]   ;;  %v800_v4 = vld [vmem:[#allocation5 + $0x60] ss:$8 sps:$4 sm:$0xff]  }
  0x36   :  { %196 = vmatpush1.bf16.msra.mxu0 %v797_v2  ;;  %v801_v5 = vld [vmem:[#allocation5 + $0x54] ss:$8 sps:$4 sm:$0xff]   ;;  %v803_v6 = vld [vmem:[#allocation5 + $0x50] ss:$8 sps:$4 sm:$0xff]   ;;  %v804_v7 = vld [vmem:[#allocation5 + $0x44] ss:$8 sps:$4 sm:$0xff]  }
  0x37   :  { %197 = vmatprep.subr.bf16.mxu0 %v798_v3  ;;  %v806_v8 = vld [vmem:[#allocation5 + $0x40] ss:$8 sps:$4 sm:$0xff]   ;;  %v807_v9 = vld [vmem:[#allocation5 + $0x34] ss:$8 sps:$4 sm:$0xff]   ;;  %v822_v11 = vld [vmem:[#allocation7 + $0x70] ss:$8 sps:$4 sm:$0xff]  }
  0x38   :  { %v820_v10 = vld [vmem:[#allocation7 + $0x74] ss:$8 sps:$4 sm:$0xff]   ;;  %v823_v12 = vld [vmem:[#allocation7 + $0x64] ss:$8 sps:$4 sm:$0xff]   ;;  %v809_v13 = vld [vmem:[#allocation5 + $0x30] ss:$8 sps:$4 sm:$0xff]  }
  0x39   :  { %445 = vmatprep.subr.bf16.mxu1 %v820_v10  ;;  %v825_v14 = vld [vmem:[#allocation7 + $0x60] ss:$8 sps:$4 sm:$0xff]   ;;  %v810_v15 = vld [vmem:[#allocation5 + $0x24] ss:$8 sps:$4 sm:$0xff]   ;;  %v826_v16 = vld [vmem:[#allocation7 + $0x54] ss:$8 sps:$4 sm:$0xff]  }
  0x3a   :  { %198 = vmatpush1.bf16.msra.mxu0 %v800_v4  ;;  %446 = vmatpush1.bf16.msra.mxu1 %v822_v11  ;;  %v812_v17 = vld [vmem:[#allocation5 + $0x20] ss:$8 sps:$4 sm:$0xff]   ;;  %v828_v18 = vld [vmem:[#allocation7 + $0x50] ss:$8 sps:$4 sm:$0xff]   ;;  %v813_v19 = vld [vmem:[#allocation5 + $0x14] ss:$8 sps:$4 sm:$0xff]  }
  0x3b   :  { %199 = vmatprep.subr.bf16.mxu0 %v801_v5  ;;  %447 = vmatprep.subr.bf16.mxu1 %v823_v12  ;;  %v829_v20 = vld [vmem:[#allocation7 + $0x44] ss:$8 sps:$4 sm:$0xff]   ;;  %v815_v21 = vld [vmem:[#allocation5 + $0x10] ss:$8 sps:$4 sm:$0xff]   ;;  %v831_v22 = vld [vmem:[#allocation7 + $0x40] ss:$8 sps:$4 sm:$0xff]  }
  0x3c   :  { %v816_v23 = vld [vmem:[#allocation5 + $0x4] ss:$8 sps:$4 sm:$0xff]   ;;  %v832_v24 = vld [vmem:[#allocation7 + $0x34] ss:$8 sps:$4 sm:$0xff]   ;;  %v818_v25 = vld [vmem:[#allocation5] ss:$8 sps:$4 sm:$0xff]  }
  0x3d   :  { %v834_v26 = vld [vmem:[#allocation7 + $0x30] ss:$8 sps:$4 sm:$0xff]   ;;  %v835_v28 = vld [vmem:[#allocation7 + $0x24] ss:$8 sps:$4 sm:$0xff]   ;;  %v837_v29 = vld [vmem:[#allocation7 + $0x20] ss:$8 sps:$4 sm:$0xff]  }
  0x3e   :  { %200 = vmatpush1.bf16.msra.mxu0 %v803_v6  ;;  %448 = vmatpush1.bf16.msra.mxu1 %v825_v14  ;;  %v819_v27 = vld [vmem:[#allocation2] sm:$0xff]   ;;  %v841_v32 = vld [vmem:[#allocation7 + $0x4] ss:$8 sps:$4 sm:$0xff]   ;;  %v843_v33 = vld [vmem:[#allocation7] ss:$8 sps:$4 sm:$0xff]   ;;  %v100_v61 = vshrl.u32 %v99_v60, 7 }
  0x3f   :  { %201 = vmatprep.subr.bf16.mxu0 %v804_v7  ;;  %449 = vmatprep.subr.bf16.mxu1 %v826_v16  ;;  %v838_v30 = vld [vmem:[#allocation7 + $0x14] ss:$8 sps:$4 sm:$0xff]   ;;  %v840_v31 = vld [vmem:[#allocation7 + $0x10] ss:$8 sps:$4 sm:$0xff]   ;;  %v847_v36 = vld [vmem:[#allocation7 + $0xe4] ss:$8 sps:$4 sm:$0xff]  }
  0x40   :  { %v844_v34 = vld [vmem:[#allocation7 + $0xf4] ss:$8 sps:$4 sm:$0xff]   ;;  %v846_v35 = vld [vmem:[#allocation7 + $0xf0] ss:$8 sps:$4 sm:$0xff]   ;;  %v849_v37 = vld [vmem:[#allocation7 + $0xe0] ss:$8 sps:$4 sm:$0xff]  }
  0x41   :  { %v850_v38 = vld [vmem:[#allocation7 + $0xd4] ss:$8 sps:$4 sm:$0xff]   ;;  %v852_v39 = vld [vmem:[#allocation7 + $0xd0] ss:$8 sps:$4 sm:$0xff]   ;;  %v853_v40 = vld [vmem:[#allocation7 + $0xc4] ss:$8 sps:$4 sm:$0xff]  }
  0x42   :  { %202 = vmatpush1.bf16.msra.mxu0 %v806_v8  ;;  %450 = vmatpush1.bf16.msra.mxu1 %v828_v18  ;;  %v855_v41 = vld [vmem:[#allocation7 + $0xc0] ss:$8 sps:$4 sm:$0xff]   ;;  %v856_v42 = vld [vmem:[#allocation7 + $0xb4] ss:$8 sps:$4 sm:$0xff]   ;;  %v858_v43 = vld [vmem:[#allocation7 + $0xb0] ss:$8 sps:$4 sm:$0xff]  }
  0x43   :  { %203 = vmatprep.subr.bf16.mxu0 %v807_v9  ;;  %451 = vmatprep.subr.bf16.mxu1 %v829_v20  ;;  %v859_v44 = vld [vmem:[#allocation7 + $0xa4] ss:$8 sps:$4 sm:$0xff]   ;;  %v861_v45 = vld [vmem:[#allocation7 + $0xa0] ss:$8 sps:$4 sm:$0xff]   ;;  %v862_v46 = vld [vmem:[#allocation7 + $0x94] ss:$8 sps:$4 sm:$0xff]  }
  0x44   :  { %v864_v47 = vld [vmem:[#allocation7 + $0x90] ss:$8 sps:$4 sm:$0xff]   ;;  %v865_v48 = vld [vmem:[#allocation7 + $0x84] ss:$8 sps:$4 sm:$0xff]   ;;  %v867_v49 = vld [vmem:[#allocation7 + $0x80] ss:$8 sps:$4 sm:$0xff]  }
  0x45   :  { %v868_v50 = vld [vmem:[#allocation8 + $0x78] sm:$0xff]   ;;  %v870_v52 = vld [vmem:[#allocation8 + $0x70] sm:$0xff]   ;;  %v873_v55 = vld [vmem:[#allocation8 + $0x28] sm:$0xff]   ;;  %v101_v62 = vsub.s32 0, %v100_v61  ;;  %v105_v1 = vsub.s32 1, %v100_v61  ;;  %s1001_s19 = smov [#allocation10]  }
  0x46   :  { %204 = vmatpush1.bf16.msra.mxu0 %v809_v13  ;;  %452 = vmatpush1.bf16.msra.mxu1 %v831_v22  ;;  %v869_v51 = vld [vmem:[#allocation8 + $0x38] sm:$0xff]   ;;  %v871_v53 = vld [vmem:[#allocation8 + $0x30] sm:$0xff]   ;;  %v874_v56 = vld [vmem:[#allocation8 + $0x60] sm:$0xff]   ;;  %s683_s20 = sshll.u32 %s1001_s19, 4  ;;  %s684_s20 = int_to_ptr.vmem [resolvable:$true] %s683_s20 }
  0x47   :  { %205 = vmatprep.subr.bf16.mxu0 %v810_v15  ;;  %453 = vmatprep.subr.bf16.mxu1 %v832_v24  ;;  %v875_v57 = vld [vmem:[#allocation8 + $0x20] sm:$0xff]   ;;  %v876_v58 = vld [vmem:[#allocation8 + $0x58] sm:$0xff]   ;;  %v878_v16 = vld [vmem:[#allocation8 + $0x50] sm:$0xff]   ;;  %p969_p7 = scmp.lt.s32.totalorder %s684_s20, %s684_s20 }
  0x48   :  { %v877_v59 = vld [vmem:[#allocation8 + $0x18] sm:$0xff]   ;;  %v880_v18 = vld [vmem:[#allocation8 + $0x48] sm:$0xff]   ;;  %v882_v20 = vld [vmem:[#allocation8 + $0x40] sm:$0xff]  }
  0x49   :  { %v79_v63 = vld [vmem:[%s1074_s4] sm:$0x3]  ;;  %v80_v22 = vld [vmem:[%s1074_s4 + $0x2] sm:$0x3] }
  0x4a   :  { %206 = vmatpush1.bf16.msra.mxu0 %v812_v17  ;;  %454 = vmatpush1.bf16.msra.mxu1 %v834_v26  ;;  %v102_v3 = vrot.slane %v79_v63, %v101_v62  ;;  %v106_v5 = vrot.slane %v79_v63, %v105_v1  ;;  %v879_v17 = vld [vmem:[#allocation8 + $0x10] sm:$0xff]   ;;  %v278_v24 = vrot.slane %v80_v22, %v101_v62 }
  0x4b   :  { %207 = vmatprep.subr.bf16.mxu0 %v813_v19  ;;  %455 = vmatprep.subr.bf16.mxu1 %v835_v28  ;;  %v881_v19 = vld [vmem:[#allocation8 + $0x8] sm:$0xff]   ;;  %v282_v26 = vrot.slane %v80_v22, %v105_v1 }
  0x4e   :  { %208 = vmatpush1.bf16.msra.mxu0 %v815_v21  ;;  %456 = vmatpush1.bf16.msra.mxu1 %v837_v29  ;;  %v883_v21 = vld [vmem:[#allocation8] sm:$0xff]  }
  0x4f   :  { %209 = vmatprep.subr.bf16.mxu0 %v816_v23  ;;  %457 = vmatprep.subr.bf16.mxu1 %v838_v30 }
  0x52   :  { %210 = vmatpush1.bf16.msra.mxu0 %v818_v25  ;;  %458 = vmatpush1.bf16.msra.mxu1 %v840_v31 }
  0x53   :  { %459 = vmatprep.subr.bf16.mxu1 %v841_v32  ;;  %763 = vmatprep.subr.bf16.mxu0 %v868_v50 }
  0x55   :  { %228 = vmatmul.mubr.bf16.vlgmr.msra.gmra.mxu0 %v819_v27 }
  0x56   :  { %460 = vmatpush1.bf16.msra.mxu1 %v843_v33  ;;  %764 = vmatpush3.bf16.msra.mxu0 %v869_v51 }
  0x57   :  { %461 = vmatprep.subr.bf16.mxu1 %v844_v34  ;;  %765 = vmatprep.subr.bf16.mxu0 %v870_v52 }
  0x5a   :  { %462 = vmatpush2.bf16.msra.mxu1 %v846_v35  ;;  %766 = vmatpush3.bf16.msra.mxu0 %v871_v53 }
  0x5b   :  { %463 = vmatprep.subr.bf16.mxu1 %v847_v36  ;;  %767 = vmatprep.subr.bf16.mxu0 %v872_v54 }
  0x5e   :  { %464 = vmatpush2.bf16.msra.mxu1 %v849_v37  ;;  %768 = vmatpush3.bf16.msra.mxu0 %v873_v55 }
  0x5f   :  { %465 = vmatprep.subr.bf16.mxu1 %v850_v38  ;;  %769 = vmatprep.subr.bf16.mxu0 %v874_v56  ;;  %v746_v38 = vld [vmem:[%s1074_s4 + $0x4] ss:$0 sm:$0xff]  ;;  %s964_s4 = scalar_lea.vmem %s684_s20, 256 }
  0x60   :  { %p965_p6 = scmp.ne.s32.totalorder %s684_s20, %s964_s4  ;;  %p970_p8 = scmp.lt.s32.totalorder %s964_s4, %s964_s4 }
  0x62   :  { %466 = vmatpush2.bf16.msra.mxu1 %v852_v39  ;;  %770 = vmatpush3.bf16.msra.mxu0 %v875_v57  ;;  %p971_p9 = por %p970_p8, %p969_p7 }
  0x63   :  { %467 = vmatprep.subr.bf16.mxu1 %v853_v40  ;;  %771 = vmatprep.subr.bf16.mxu0 %v876_v58 }
  0x64   :  { %p972_p10 = pnand %p971_p9, %p965_p6 }
  0x66   :  { %468 = vmatpush2.bf16.msra.mxu1 %v855_v41  ;;  %772 = vmatpush3.bf16.msra.mxu0 %v877_v59 }
  0x67   :  { %469 = vmatprep.subr.bf16.mxu1 %v856_v42  ;;  %773 = vmatprep.subr.bf16.mxu0 %v878_v16  ;;  %v668_v42 = vand.u32 127, %v99_v60 }
  0x69   :  { %vm673_vm0 = vcmp.ge.s32.totalorder %v668_v42, 4 }
  0x6a   :  { %470 = vmatpush2.bf16.msra.mxu1 %v858_v43  ;;  %774 = vmatpush3.bf16.msra.mxu0 %v879_v17 }
  0x6b   :  { %471 = vmatprep.subr.bf16.mxu1 %v859_v44  ;;  %775 = vmatprep.subr.bf16.mxu0 %v880_v18 }
  0x6e   :  { %472 = vmatpush2.bf16.msra.mxu1 %v861_v45  ;;  %776 = vmatpush3.bf16.msra.mxu0 %v881_v19 }
  0x6f   :  { %473 = vmatprep.subr.bf16.mxu1 %v862_v46  ;;  %777 = vmatprep.subr.bf16.mxu0 %v882_v20 }
  0x72   :  { %474 = vmatpush2.bf16.msra.mxu1 %v864_v47  ;;  %778 = vmatpush3.bf16.msra.mxu0 %v883_v21 }
  0x73   :  { %475 = vmatprep.subr.bf16.mxu1 %v865_v48 }
  0x76   :  { %476 = vmatpush2.bf16.msra.mxu1 %v867_v49 }
 0x115   :  { %v229_v2 = vpop.f32.mrf.mxu0 }
 0x116   :  { %v230_v8 = vadd.f32 %v229_v2, %v102_v3 }
 0x117   :  { %v231_v4 = vpop.f32.mrf.mxu0 }
 0x118   :  { %v232_v10 = vadd.f32 %v231_v4, %v106_v5 }
 0x119   :  { %v233_v6 = vpop.f32.mrf.mxu0 }
 0x11a   :  { %v234_v7 = vadd.f32 %v233_v6, %v102_v3 }
 0x11b   :  { %v235_v9 = vpop.f32.mrf.mxu0 }
 0x11c   :  { %v236_v11 = vadd.f32 %v235_v9, %v106_v5  ;;  %v238_v12 = vpack.c.bf16 %v234_v7, %v230_v8 }
 0x11e   :  { %v239_v13 = vpack.c.bf16 %v236_v11, %v232_v10  ;;  %v240_v15 = vmax.bf16 %v1000_v0, %v238_v12 }
 0x120   :  { %v241_v14 = vmax.bf16 %v1000_v0, %v239_v13 }
 0x122   :  { %477 = vmatprep.mubr.bf16.mxu1 %v241_v14 }
 0x123   :  { %478 = vmatmul.mubr.bf16.vlgmr.msra.gmra.mxu1 %v240_v15 }
 0x1e3   :  { %v479_v23 = vpop.f32.mrf.mxu1 }
 0x1e4   :  { %v480_v29 = vadd.f32 %v479_v23, %v278_v24 }
 0x1e5   :  { %v481_v25 = vpop.f32.mrf.mxu1 }
 0x1e6   :  { %v482_v31 = vadd.f32 %v481_v25, %v282_v26 }
 0x1e7   :  { %v483_v27 = vpop.f32.mrf.mxu1 }
 0x1e8   :  { %v484_v28 = vadd.f32 %v483_v27, %v278_v24 }
 0x1e9   :  { %v485_v30 = vpop.f32.mrf.mxu1 }
 0x1ea   :  { %v486_v32 = vadd.f32 %v485_v30, %v282_v26  ;;  %v488_v33 = vpack.c.bf16 %v484_v28, %v480_v29 }
 0x1ec   :  { %v489_v34 = vpack.c.bf16 %v486_v32, %v482_v31  ;;  %v490_v36 = vmax.bf16 %v1000_v0, %v488_v33 }
 0x1ee   :  { %v491_v35 = vmax.bf16 %v1000_v0, %v489_v34 }
 0x1f0   :  { %658 = vmatprep.mubr.bf16.mxu0 %v491_v35 }
 0x1f1   :  { %659 = vmatmul.mubr.bf16.vlgmr.msra.gmra.mxu0 %v490_v36 }
 0x2b1   :  { %v779_v37 = vpop.f32.mrf.mxu0 }
 0x2b3   :  { %v780_v39 = vpop.f32.mrf.mxu0 }
 0x2b4   :  { %v781_v40 = vadd.f32 %v780_v39, %v779_v37 }
 0x2b5   :  { %v782_v41 = vpop.f32.mrf.mxu0 }
 0x2b6   :  { %v661_v43 = vadd.f32 %v781_v40, %v746_v38 }
 0x2b7   :  { %v783_v44 = vpop.f32.mrf.mxu0 }
 0x2b8   :  { %v669_v45 = vmax.f32 %v661_v43, -20.0  ;;  %v784_v46 = vadd.f32 %v783_v44, %v782_v41 }
 0x2ba   :  { %v671_v47 = vmin.f32 %v669_v45, 2.0  ;;  %v664_v48 = vadd.f32 %v784_v46, %v746_v38 }
 0x2bc   :  { %v670_v49 = vmax.f32 %v664_v48, -20.0  ;;  %v674_v0 = vsel %vm673_vm0, %v671_v47, %v661_v43 }
 0x2bd   :  { %676 = vst [vmem:[#allocation10] sm:$0xff] %v674_v0 }
 0x2be   :  { %v672_v50 = vmin.f32 %v670_v49, 2.0 }
 0x2c0   :  { %v675_v51 = vsel %vm673_vm0, %v672_v50, %v664_v48 }
 0x2c1   :  { %677 = vst [vmem:[#allocation10 + $0x8] sm:$0xff] %v675_v51 }
 0x2c2   :  { %975 = shalt.err (!%p972_p10)
}
 0x2c3   :  { %689 = dma.vmem_to_hbm [thread:$0]  %s684_s20, 256, %s1075_s5, [#allocation4], %s993_s21, %s993_s21, %s994_s22  }
 0x2c4   :  { %990 = dma.done.wait [#allocation4], 256  }
 0x2c5   :  { %991 = vsyncadd [#allocation4], 4294967040 }
 0x2c6   :  { %693 = vsyncpa [#allocation3], 1 }
 0x2c7   :  { %694 = vsyncpa [#allocation6], 1 }
 0x2c8   :  { %695 = vsyncpa [#allocation9], 1 }
 0x2c9   :  { %696 = vsyncpa [#allocation4], 1 }

</bundles_post_ra>
